<compile_context>
chip_gen: v6e
topology: v6e:2x2x1
jax: 0.10.0
libtpu: 0.0.40
codegen_flags: <defaults>
</compile_context>

<pallas_src>
import functools

import jax
import jax.numpy as jnp
from jax.experimental import pallas as pl
from jax.experimental.pallas import tpu as pltpu

_LANE = 128


def _vmem_capacity_bytes():
    try:
        return int(pltpu.get_tpu_info().vmem_capacity_bytes)
    except Exception:
        return 64 << 20  # conservative fallback (v7x per-TC VMEM)


def _pick_hw_tile(hw, row_bytes, target_bytes):
    """HW tile: full extent if it fits the budget, else a multiple-of-128 tile.

    The returned tile never exceeds the byte budget, regardless of whether HW
    is divisible by 128; non-dividing tiles use a cdiv grid (tail blocks are
    lane-masked in the reduction phase, and stores are masked in the scale
    phase), so blocks can never blow past physical VMEM.
    """
    row_bytes = max(row_bytes, 1)
    max_lanes = max(_LANE, (target_bytes // row_bytes) // _LANE * _LANE)
    if hw <= max_lanes:
        return hw  # full extent: always a legal block shape, no masking needed
    best = 0
    t = _LANE
    while t <= max_lanes:
        if hw % t == 0:
            best = t
        t += _LANE
    return best if best else max_lanes


def _pick_batch_tile(b, per_batch_bytes, target_bytes):
    """Largest divisor of b whose packed block stays within the byte budget."""
    best = 1
    for t in range(1, b + 1):
        if b % t == 0 and t * per_batch_bytes <= target_bytes:
            best = t
    return best


def _fused_kernel(x_ref, wt_ref, b_ref, o_ref, *, inv_hw):
    # x_ref/o_ref: (B, C, HW); wt_ref: (C, C) = W^T; b_ref: (1, C).
    x = x_ref[...]
    pooled = jnp.sum(x.astype(jnp.float32), axis=-1) * inv_hw           # (B, C)
    y = jnp.dot(pooled, wt_ref[...].astype(jnp.float32),
                preferred_element_type=jnp.float32)
    y = y + b_ref[...].astype(jnp.float32)
    s = jax.nn.sigmoid(y).astype(x.dtype)                               # (B, C)
    o_ref[...] = x * s[:, :, None]


def _pool_sum_kernel(x_ref, sum_ref, *, hw_total, hw_tile, need_mask):
    # x_ref: (bt, C, hw_tile); sum_ref: (bt, C) f32 spatial sums (accumulator).
    k = pl.program_id(1)

    @pl.when(k == 0)
    def _():
        sum_ref[...] = jnp.zeros_like(sum_ref)

    x = x_ref[...].astype(jnp.float32)
    if need_mask:  # static: only emitted when HW % hw_tile != 0
        lane = jax.lax.broadcasted_iota(jnp.int32, x.shape, 2)
        x = jnp.where(lane + k * hw_tile < hw_total, x, 0.0)
    sum_ref[...] += jnp.sum(x, axis=-1)


def _scale_kernel(s_ref, x_ref, o_ref):
    # s_ref: (bt, C, 1) in x's dtype; x_ref/o_ref: (bt, C, hw_tile).
    o_ref[...] = x_ref[...] * s_ref[...]


def channel_attention(x_nchw, weight, bias, *, target_block_bytes=None,
                      force_two_phase=False):
    """x_nchw: (B, C, H, W); weight: Conv2d(C, C, 1) kernel (C, C[, 1, 1]); bias: (C,)."""
    B, C, H, W = x_nchw.shape
    HW = H * W
    itemsize = jnp.dtype(x_nchw.dtype).itemsize
    cap = _vmem_capacity_bytes()
    if target_block_bytes is None:
        # ~2 MiB blocks on 64 MiB-VMEM parts (v7x), ~4 MiB on 128 MiB parts (v5e/v6e).
        target_block_bytes = (4 << 20) if cap >= (96 << 20) else (2 << 20)

    x = x_nchw.reshape(B, C, HW)
    # Host-side layout prep so kernels never transpose:
    w_t = jnp.asarray(weight).reshape(C, C).T      # (C_in, C_out): y = pooled @ W^T
    b_row = jnp.asarray(bias).reshape(1, C)

    x_bytes = B * C * HW * itemsize
    fused_ok = (not force_two_phase) and (x_bytes <= cap // 8)

    if fused_ok:
        # -------- Fused single-pass path: x read from HBM exactly once --------
        vmem = int(max(min(cap, 4 * x_bytes + 2 * (C * C + C) * 4 + (2 << 20)),
                       16 << 20))
        out_flat = pl.pallas_call(
            functools.partial(_fused_kernel, inv_hw=1.0 / float(HW)),
            out_shape=jax.ShapeDtypeStruct((B, C, HW), x_nchw.dtype),
            grid_spec=pltpu.PrefetchScalarGridSpec(
                num_scalar_prefetch=0,
                grid=(1,),
                in_specs=[
                    pl.BlockSpec((B, C, HW), lambda i: (0, 0, 0)),
                    pl.BlockSpec((C, C), lambda i: (0, 0)),
                    pl.BlockSpec((1, C), lambda i: (0, 0)),
                ],
                out_specs=pl.BlockSpec((B, C, HW), lambda i: (0, 0, 0)),
            ),
            compiler_params=pltpu.CompilerParams(
                dimension_semantics=("arbitrary",),
                vmem_limit_bytes=vmem,
            ),
        )(x, w_t, b_row)
        return out_flat.reshape(B, C, H, W)

    # ------------------- Two-phase path for larger inputs -------------------
    hw_t = _pick_hw_tile(HW, C * itemsize, target_block_bytes)
    bt = _pick_batch_tile(B, C * hw_t * itemsize, target_block_bytes)
    n_b, n_hw = B // bt, (HW + hw_t - 1) // hw_t
    x_blk = bt * C * hw_t * itemsize
    need_mask = (HW % hw_t) != 0

    # Phase 1: pooled spatial sums (B, C) in f32; B tiles parallel, HW reduction.
    vmem1 = int(max(min(cap, 2 * x_blk + 2 * bt * C * 4 + (2 << 20)), 16 << 20))
    sums = pl.pallas_call(
        functools.partial(_pool_sum_kernel, hw_total=HW, hw_tile=hw_t,
                          need_mask=need_mask),
        out_shape=jax.ShapeDtypeStruct((B, C), jnp.float32),
        grid_spec=pltpu.PrefetchScalarGridSpec(
            num_scalar_prefetch=0,
            grid=(n_b, n_hw),
            in_specs=[pl.BlockSpec((bt, C, hw_t), lambda b, k: (b, 0, k))],
            out_specs=pl.BlockSpec((bt, C), lambda b, k: (b, 0)),
        ),
        compiler_params=pltpu.CompilerParams(
            dimension_semantics=("parallel", "arbitrary"),
            vmem_limit_bytes=vmem1,
        ),
    )(x)

    # 1x1 conv (FC) + bias + sigmoid on the tiny (B, C) pooled tensor, hoisted
    # to plain jnp: no constant (C, C) weight block double-buffered in a kernel.
    pooled = sums * (1.0 / float(HW))
    s = jax.nn.sigmoid(pooled @ w_t + b_row)                  # (B, C) f32
    s3 = s.astype(x_nchw.dtype).reshape(B, C, 1)              # native-dtype scale

    # Phase 2: out = x * s (broadcast over HW), pure streaming, fully parallel.
    vmem2 = int(max(min(cap, 4 * x_blk + 2 * bt * C * itemsize + (2 << 20)),
                    16 << 20))
    out_flat = pl.pallas_call(
        _scale_kernel,
        out_shape=jax.ShapeDtypeStruct((B, C, HW), x_nchw.dtype),
        grid_spec=pltpu.PrefetchScalarGridSpec(
            num_scalar_prefetch=0,
            grid=(n_b, n_hw),
            in_specs=[
                pl.BlockSpec((bt, C, 1), lambda b, k: (b, 0, 0)),     # tiny scale tile
                pl.BlockSpec((bt, C, hw_t), lambda b, k: (b, 0, k)),
            ],
            out_specs=pl.BlockSpec((bt, C, hw_t), lambda b, k: (b, 0, k)),
        ),
        compiler_params=pltpu.CompilerParams(
            dimension_semantics=("parallel", "parallel"),
            vmem_limit_bytes=vmem2,
        ),
    )(s3, x)

    return out_flat.reshape(B, C, H, W)


def _reference(x, weight, bias):
    pooled = jnp.mean(x, axis=(2, 3), keepdims=True)          # (B, C, 1, 1)
    y = jnp.einsum("oc,bcij->boij", weight, pooled) + bias.reshape(1, -1, 1, 1)
    return x * jax.nn.sigmoid(y)


if __name__ == "__main__":
    key = jax.random.PRNGKey(0)
    kx, kw, kb, kx2 = jax.random.split(key, 4)

    # --- Small test: exercises the fused single-pass path ---
    B, C, H, W = 2, 4, 16, 16
    x = jax.random.normal(kx, (B, C, H, W), dtype=jnp.float32)

    # Deterministic synthetic init for Conv2d(C, C, 1, bias=True)
    # (weight shape (C, C, 1, 1) collapsed to (C, C)).
    fan_in = C
    bound = 1.0 / (fan_in ** 0.5)
    weight = jax.random.uniform(kw, (C, C), minval=-bound, maxval=bound,
                                dtype=jnp.float32)
    bias = jax.random.uniform(kb, (C,), minval=-bound, maxval=bound,
                              dtype=jnp.float32)

    out = channel_attention(x, weight, bias)
    jax.block_until_ready(out)
    ref = _reference(x, weight, bias)
    assert out.shape == (B, C, H, W)
    assert jnp.allclose(out, ref, atol=1e-5, rtol=1e-5)

    # --- Small forced test: two-phase path with HW not a multiple of 128
    #     (cdiv grid + lane-masked tail tiles in the pooling reduction) ---
    B2, C2, H2, W2 = 2, 16, 25, 40                 # HW = 1000
    x2 = jax.random.normal(kx2, (B2, C2, H2, W2), dtype=jnp.float32)
    w2 = jax.random.uniform(kw, (C2, C2), minval=-0.25, maxval=0.25,
                            dtype=jnp.float32)
    b2 = jax.random.uniform(kb, (C2,), minval=-0.25, maxval=0.25,
                            dtype=jnp.float32)
    out2 = channel_attention(x2, w2, b2, target_block_bytes=8 * 1024,
                             force_two_phase=True)
    jax.block_until_ready(out2)
    ref2 = _reference(x2, w2, b2)
    assert out2.shape == (B2, C2, H2, W2)
    assert jnp.allclose(out2, ref2, atol=1e-5, rtol=1e-5)

    print("KERNEL_OK")
</pallas_src>

<mosaic_0001>
module attributes {stable_mosaic.version = 11 : i64} {
  func.func @_fused_kernel(%arg0: i32, %arg1: memref<2x4x256xf32, #tpu.memory_space<vmem>>, %arg2: memref<4x4xf32, #tpu.memory_space<vmem>>, %arg3: memref<1x4xf32, #tpu.memory_space<vmem>>, %arg4: memref<2x4x256xf32, #tpu.memory_space<vmem>>) attributes {dimension_semantics = [#tpu.dimension_semantics<arbitrary>], iteration_bounds = array<i64: 1>, scalar_prefetch = 0 : i64, scratch_operands = 0 : i64, tpu.core_type = #tpu.core_type<tc>, window_params = [{pipeline_mode = #tpu.pipeline_mode<synchronous>, transform_indices = @transform_0, window_bounds = array<i64: 2, 4, 256>}, {pipeline_mode = #tpu.pipeline_mode<synchronous>, transform_indices = @transform_1, window_bounds = array<i64: 4, 4>}, {pipeline_mode = #tpu.pipeline_mode<synchronous>, transform_indices = @transform_2, window_bounds = array<i64: 1, 4>}, {pipeline_mode = #tpu.pipeline_mode<synchronous>, transform_indices = @transform_3, window_bounds = array<i64: 2, 4, 256>}]} {
    %c0 = arith.constant 0 : index
    %c0_0 = arith.constant 0 : index
    %c0_1 = arith.constant 0 : index
    %0 = vector.load %arg1[%c0, %c0_0, %c0_1] : memref<2x4x256xf32, #tpu.memory_space<vmem>>, vector<2x4x256xf32>
    %cst = arith.constant dense<0.000000e+00> : vector<2x4xf32>
    %1 = vector.multi_reduction <add>, %0, %cst [2] : vector<2x4x256xf32> to vector<2x4xf32>
    %cst_2 = arith.constant 3.906250e-03 : f32
    %2 = vector.broadcast %cst_2 : f32 to vector<2x4xf32>
    %3 = arith.mulf %1, %2 : vector<2x4xf32>
    %c0_3 = arith.constant 0 : index
    %c0_4 = arith.constant 0 : index
    %4 = vector.load %arg2[%c0_3, %c0_4] : memref<4x4xf32, #tpu.memory_space<vmem>>, vector<4x4xf32>
    %cst_5 = arith.constant dense<0.000000e+00> : vector<2x4xf32>
    %5 = tpu.matmul %3, %4, %cst_5 {dimension_numbers = #tpu.dot_dimension_numbers<[1], [0], [0], [1], [0, 0, 1, 1], [], []>} : vector<2x4xf32>, vector<4x4xf32>, vector<2x4xf32> -> vector<2x4xf32>
    %c0_6 = arith.constant 0 : index
    %c0_7 = arith.constant 0 : index
    %6 = vector.load %arg3[%c0_6, %c0_7] : memref<1x4xf32, #tpu.memory_space<vmem>>, vector<1x4xf32>
    %7 = vector.broadcast %6 : vector<1x4xf32> to vector<2x4xf32>
    %8 = arith.addf %5, %7 : vector<2x4xf32>
    %9 = arith.negf %8 : vector<2x4xf32>
    %10 = math.exp %9 : vector<2x4xf32>
    %cst_8 = arith.constant 1.000000e+00 : f32
    %11 = vector.broadcast %cst_8 : f32 to vector<2x4xf32>
    %12 = arith.addf %11, %10 : vector<2x4xf32>
    %13 = arith.divf %11, %12 : vector<2x4xf32>
    %14 = vector.shape_cast %13 : vector<2x4xf32> to vector<2x4x1xf32>
    %15 = vector.broadcast %14 : vector<2x4x1xf32> to vector<2x4x256xf32>
    %16 = arith.mulf %0, %15 : vector<2x4x256xf32>
    %c0_9 = arith.constant 0 : index
    %c0_10 = arith.constant 0 : index
    %c0_11 = arith.constant 0 : index
    %17 = vector.load %arg4[%c0_9, %c0_10, %c0_11] : memref<2x4x256xf32, #tpu.memory_space<vmem>>, vector<2x4x256xf32>
    tpu.vector_store %arg4[%c0_9, %c0_10, %c0_11], %16 {strides = array<i32>} : memref<2x4x256xf32, #tpu.memory_space<vmem>>, vector<2x4x256xf32>,
    return
  }
  func.func @transform_0(%arg0: i32) -> (i32, i32, i32) {
    %c0_i32 = arith.constant 0 : i32
    %c0_i32_0 = arith.constant 0 : i32
    %c0_i32_1 = arith.constant 0 : i32
    %c0_i32_2 = arith.constant 0 : i32
    return %c0_i32, %c0_i32_0, %c0_i32_1 : i32, i32, i32
  }
  func.func @transform_1(%arg0: i32) -> (i32, i32) {
    %c0_i32 = arith.constant 0 : i32
    %c0_i32_0 = arith.constant 0 : i32
    %c0_i32_1 = arith.constant 0 : i32
    return %c0_i32, %c0_i32_0 : i32, i32
  }
  func.func @transform_2(%arg0: i32) -> (i32, i32) {
    %c0_i32 = arith.constant 0 : i32
    %c0_i32_0 = arith.constant 0 : i32
    %c0_i32_1 = arith.constant 0 : i32
    return %c0_i32, %c0_i32_0 : i32, i32
  }
  func.func @transform_3(%arg0: i32) -> (i32, i32, i32) {
    %c0_i32 = arith.constant 0 : i32
    %c0_i32_0 = arith.constant 0 : i32
    %c0_i32_1 = arith.constant 0 : i32
    %c0_i32_2 = arith.constant 0 : i32
    return %c0_i32, %c0_i32_0, %c0_i32_1 : i32, i32, i32
  }
}

</mosaic_0001>

<bundles_post_ra>
// kernel: tpu_custom_call.1
= control target key start
LH: loop header
LB: loop body
LE: loop exit
PB: predicated region body
PF: predicated region fallthrough
CT: control target
= control target key end

     0   :  { %8 = vsyncpa [#allocation3], 0  ;;  %s362_s0 = inlined_call_operand.hbm [shape: f32[2,4,256], index: 0, kind: input, shape index: {}]   ;;  %s363_s1 = inlined_call_operand.hbm [shape: f32[4,4], index: 1, kind: input, shape index: {}]   ;;  %s364_s2 = inlined_call_operand.vmem [shape: f32[1,4], index: 2, kind: input, shape index: {}]   ;;  %s365_s3 = inlined_call_operand.hbm [shape: f32[2,4,256], index: 3, kind: output, shape index: {}]  }
   0x1   :  { %9 = vsyncpa [#allocation6], 0 }
   0x2   :  { %10 = vsyncpa [#allocation4], 0  ;;  %s311_s12 = smov [#allocation2]  }
   0x3   :  { %s16_s13 = sshll.u32 %s311_s12, 4  ;;  %s17_s13 = int_to_ptr.vmem [resolvable:$true] %s16_s13 }
   0x4   :  { %s253_s14 = scalar_lea.vmem %s17_s13, 256  ;;  %p258_p1 = scmp.lt.s32.totalorder %s17_s13, %s17_s13 }
   0x5   :  { %p254_p0 = scmp.ne.s32.totalorder %s17_s13, %s253_s14  ;;  %p259_p2 = scmp.lt.s32.totalorder %s253_s14, %s253_s14 }
   0x7   :  { %p260_p3 = por %p259_p2, %p258_p1 }
   0x9   :  { %p261_p4 = pnand %p260_p3, %p254_p0 }
   0xb   :  { %264 = shalt.err (!%p261_p4)
}
   0xc   :  { %s312_s15 = smov 128   ;;  %s313_s16 = smov 8  }
   0xd   :  { %22 = dma.hbm_to_vmem [thread:$0]  %s362_s0, 256, %s17_s13, [#allocation3], %s312_s15, %s312_s15, %s313_s16  }
   0xe   :  { %s314_s19 = smov [#allocation5]  }
   0xf   :  { %s29_s20 = sshll.u32 %s314_s19, 4  ;;  %s30_s20 = int_to_ptr.vmem [resolvable:$true] %s29_s20 }
  0x10   :  { %s273_s21 = scalar_lea.vmem %s30_s20, 64  ;;  %p278_p6 = scmp.lt.s32.totalorder %s30_s20, %s30_s20 }
  0x11   :  { %p274_p5 = scmp.ne.s32.totalorder %s30_s20, %s273_s21  ;;  %p279_p7 = scmp.lt.s32.totalorder %s273_s21, %s273_s21 }
  0x13   :  { %p280_p8 = por %p279_p7, %p278_p6 }
  0x15   :  { %p281_p9 = pnand %p280_p8, %p274_p5 }
  0x17   :  { %284 = shalt.err (!%p281_p9)
}
  0x18   :  { %32 = dma.hbm_to_vmem [thread:$0]  %s363_s1, 64, %s30_s20, [#allocation6]  }
  0x19   :  { %305 = dma.done.wait [#allocation3], 256  }
  0x1a   :  { %306 = vsyncadd [#allocation3], 4294967040 }
  0x1b   :  { %307 = dma.done.wait [#allocation6], 64  }
  0x1c   :  { %308 = vsyncadd [#allocation6], 4294967232  ;;  %vm49_vm0 = vcmask 1043456   ;;  %v41_v0 = vld [vmem:[#allocation2] sm:$0xff]  ;;  %v42_v1 = vld [vmem:[#allocation2 + $0x8] sm:$0xff]  ;;  %v315_v11 = vmov 0.0   ;;  %v72_v12 = vlaneseq }
  0x1d   :  { %v45_v2 = vcombine.high %v41_v0, %v41_v0  ;;  %v50_v3 = vsel %vm49_vm0, %v41_v0, 0.0  ;;  %v46_v4 = vcombine.high %v42_v1, %v42_v1  ;;  %v55_v6 = vsel %vm49_vm0, %v42_v1, 0.0  ;;  %v62_v10 = vld [vmem:[#allocation5] sm:$0xf]  ;;  %226 = vmatprep.subr.mxu0 %v315_v11  ;;  %v220_v23 = vld [vmem:[%s364_s2] ss:$0 sm:$0xff] }
  0x1e   :  { %vm316_vm1 = vmmov 0   ;;  %227 = vmatpush3.msk.msra.mxu0 %vm49_vm0, %v62_v10  ;;  %v73_v13 = vand.u32 127, %v72_v12  ;;  %v75_v14 = vshrl.u32 %v72_v12, 7  ;;  %vm82_vm2 = vcmask 1041409   ;;  %s318_s2 = smov [#allocation7]  }
  0x1f   :  { %v51_v5 = vsel %vm49_vm0, %v45_v2, 0.0  ;;  %v56_v7 = vsel %vm49_vm0, %v46_v4, 0.0  ;;  %228 = vmatprep.mubr.msk.f32.mxu0 %vm316_vm1, %v315_v11  ;;  %vm84_vm3 = vcmask 31744   ;;  %v317_v35 = vmov 839922192   ;;  %s207_s24 = sshll.u32 %s318_s2, 4  ;;  %s208_s24 = int_to_ptr.vmem [resolvable:$true] %s207_s24 }
  0x20   :  { %v52_v8 = vadd.f32 %v51_v5, %v50_v3  ;;  %v57_v9 = vadd.f32 %v56_v7, %v55_v6  ;;  %v76_v16 = vsub.s32 %v73_v13, %v75_v14  ;;  %v168_v30 = vsub.s32 0, %v75_v14  ;;  %s285_s25 = scalar_lea.vmem %s208_s24, 256  ;;  %p290_p11 = scmp.lt.s32.totalorder %s208_s24, %s208_s24 }
  0x21   :  { %v175_v33 = vsub.s32 1, %v75_v14  ;;  %v183_v36 = vunpack.c.l.s4 %v317_v35  ;;  %p286_p10 = scmp.ne.s32.totalorder %s208_s24, %s285_s25  ;;  %p291_p12 = scmp.lt.s32.totalorder %s285_s25, %s285_s25 }
  0x22   :  { %53 = vadd.xlane.f32.xlu0 %v52_v8 }
  0x23   :  { %v184_v37 = vunpack.c.0.s8 %v183_v36  ;;  %p292_p13 = por %p291_p12, %p290_p11 }
  0x25   :  { %v187_v38 = vsub.s32 %v184_v37, %v75_v14  ;;  %p293_p0 = pnand %p292_p13, %p286_p10 }
  0x26   :  { %58 = vadd.xlane.f32.xlu0 %v57_v9 }
  0xab   :  { %v54_v15 = vpop.xlane.xlu0 %53 }
  0xac   :  { %v60_v17 = vmul.f32 0.00390625, %v54_v15 }
  0xae   :  { %v77_v20 = vrot.slane %v60_v17, %v76_v16 }
  0xaf   :  { %v59_v18 = vpop.xlane.xlu0 %58 }
  0xb0   :  { %v61_v19 = vmul.f32 0.00390625, %v59_v18 }
  0xb2   :  { %v81_v21 = vrot.slane %v61_v19, %v76_v16 }
  0xb4   :  { %v83_v22 = vsel %vm82_vm2, %v81_v21, %v77_v20 }
  0xb5   :  { %229 = vmatmul.mubr.msk.f32.vlgmr.msra.gmra.mxu0 %vm84_vm3, %v83_v22 }
 0x175   :  { %v156_v24 = vpop.f32.mrf.mxu0 }
 0x176   :  { %v157_v25 = vadd.f32 %v220_v23, %v156_v24 }
 0x177   :  { %v230_v26 = vpop.f32.mrf.mxu0 }
 0x178   :  { %v223_v27 = vmul.f32 -1.442695, %v157_v25 }
 0x17a   :  { %241 = vpow2.f32 %v223_v27 }
 0x187   :  { %v242_v28 = vpop.eup %241 }
 0x188   :  { %v163_v29 = vadd.f32 1.0, %v242_v28 }
 0x18a   :  { %243 = vrcp.f32 %v163_v29 }
 0x197   :  { %v244_v31 = vpop.eup %243 }
 0x198   :  { %v169_v32 = vrot.slane %v244_v31, %v168_v30  ;;  %v176_v34 = vrot.slane %v244_v31, %v175_v33 }
 0x19a   :  { %171 = vbcast.lane.b32.xlu1 %v169_v32, 256 }
 0x19e   :  { %178 = vbcast.lane.b32.xlu1 %v176_v34, 256 }
 0x20c   :  { %v172_v39 = vpop.permute.xlu1 %171 }
 0x20d   :  { %v188_v40 = vrot.slane %v172_v39, %v187_v38 }
 0x20f   :  { %v198_v41 = vmul.f32 %v188_v40, %v41_v0 }
 0x210   :  { %v179_v42 = vpop.permute.xlu1 %178 }
 0x211   :  { %200 = vst [vmem:[#allocation7] sm:$0xff] %v198_v41  ;;  %v195_v43 = vrot.slane %v179_v42, %v187_v38 }
 0x213   :  { %v199_v44 = vmul.f32 %v195_v43, %v42_v1 }
 0x215   :  { %201 = vst [vmem:[#allocation7 + $0x8] sm:$0xff] %v199_v44 }
 0x216   :  { %296 = shalt.err (!%p293_p0)
}
 0x217   :  { %213 = dma.vmem_to_hbm [thread:$0]  %s208_s24, 256, %s365_s3, [#allocation4], %s312_s15, %s312_s15, %s313_s16  }
 0x218   :  { %309 = dma.done.wait [#allocation4], 256  }
 0x219   :  { %310 = vsyncadd [#allocation4], 4294967040 }
 0x21a   :  { %217 = vsyncpa [#allocation3], 1 }
 0x21b   :  { %218 = vsyncpa [#allocation6], 1 }
 0x21c   :  { %219 = vsyncpa [#allocation4], 1 }

</bundles_post_ra>
